<compile_context>
chip_gen: v7x
topology: tpu7x:2x2x1
jax: 0.10.0
libtpu: 0.0.40
codegen_flags: <defaults>
</compile_context>

<pallas_src>
import functools

import jax
import jax.numpy as jnp
from jax.experimental import pallas as pl
from jax.experimental.pallas import tpu as pltpu


def vanilla_rnn_kernel(x_col_ref, whxT_ref, whhT_ref, wphT_ref, bh_ref, bp_ref,
                       out_ref, *, seq_steps, batch):
    # x_col_ref: (S1*B, 1)   time-major flattened inputs (flat index = t*B + b)
    # whxT_ref : (1, H)      (= Whx.T, input_dim == 1)
    # whhT_ref : (H, H)      (= Whh.T)
    # wphT_ref : (H, Cp)     (= Wph.T zero-padded to lane width)
    # bh_ref   : (1, H)
    # bp_ref   : (1, Cp)
    # out_ref  : (B, Cp)
    S1 = seq_steps
    B = batch
    H = whhT_ref.shape[0]

    whhT = whhT_ref[...]                                   # (H, H), loaded once

    # Hoisted input + bias contribution for ALL time steps (off the serial chain):
    # (S1*B, 1) * (1, H) + (1, H) -> (S1*B, H); sublane-aligned split into (S1, B, H).
    pre_flat = x_col_ref[...] * whxT_ref[...] + bh_ref[...]
    pre_x = pre_flat.reshape(S1, B, H)

    # h0 == 0, so the first step needs no recurrent matmul.
    h = jnp.tanh(pre_x[0])
    # Fully unrolled recurrence: per-step work is one small MXU matmul + VPU add + EUP tanh.
    for i in range(1, S1):
        h = jnp.tanh(pre_x[i] +
                     jnp.dot(h, whhT, preferred_element_type=jnp.float32))

    # Lane-dense (B, Cp) output store; padded columns of WphT / bp are zero.
    out_ref[...] = (jnp.dot(h, wphT_ref[...], preferred_element_type=jnp.float32)
                    + bp_ref[...])


def vanilla_rnn_forward(x, Whx, Whh, Wph, bh, bp):
    """x: (B, seq_length). Weights in PyTorch layout:
       Whx (H, 1), Whh (H, H), Wph (C, H), bh (H,), bp (C,). Returns (B, C)."""
    B, S = x.shape
    H, input_dim = Whx.shape
    C = Wph.shape[0]
    assert input_dim == 1, "VanillaRNN forward assumes input_dim == 1 (as the torch code does)"
    S1 = S - 1                      # torch loop runs seq_length - 1 steps
    assert S1 >= 1

    LANE = 128
    C_pad = ((C + LANE - 1) // LANE) * LANE   # lane-dense output width

    # Inputs: time-major flat column so the kernel's hoisted broadcast needs no relayout.
    x_col = x[:, :S1].T.reshape(S1 * B, 1).astype(jnp.float32)
    whxT = Whx.T.astype(jnp.float32)                               # (1, H)
    whhT = Whh.T.astype(jnp.float32)                               # (H, H)
    wphT_p = jnp.zeros((H, C_pad), jnp.float32).at[:, :C].set(Wph.T.astype(jnp.float32))
    bh2 = bh.reshape(1, H).astype(jnp.float32)
    bp_p = jnp.zeros((1, C_pad), jnp.float32).at[:, :C].set(bp.reshape(1, C).astype(jnp.float32))

    vmem = pl.BlockSpec(memory_space=pltpu.MemorySpace.VMEM)
    kernel = functools.partial(vanilla_rnn_kernel, seq_steps=S1, batch=B)

    out_pad = pl.pallas_call(
        kernel,
        out_shape=jax.ShapeDtypeStruct((B, C_pad), jnp.float32),
        in_specs=[vmem] * 6,
        out_specs=vmem,
    )(x_col, whxT, whhT, wphT_p, bh2, bp_p)
    return out_pad[:, :C]


def vanilla_rnn_reference(x, Whx, Whh, Wph, bh, bp):
    """Pure-JAX mirror of the PyTorch forward (for verification)."""
    B, S = x.shape
    H = Whh.shape[0]
    h = jnp.zeros((H, B), jnp.float32)
    for i in range(S - 1):
        xt = x[:, i].reshape(1, B)
        h = jnp.tanh(Whx @ xt + Whh @ h + bh[:, None])
    pt = Wph @ h + bp[:, None]
    return pt.T


if __name__ == "__main__":
    # Small shapes consistent with the module: input_dim must be 1.
    batch_size = 8
    seq_length = 10
    input_dim = 1
    num_hidden = 32
    num_classes = 10

    key = jax.random.PRNGKey(0)
    k_whx, k_whh, k_wph, k_bh, k_bp, k_x = jax.random.split(key, 6)
    std = 0.0001  # normal.Normal(0, 0.0001) as in __init__

    Whx = std * jax.random.normal(k_whx, (num_hidden, input_dim), jnp.float32)
    Whh = std * jax.random.normal(k_whh, (num_hidden, num_hidden), jnp.float32)
    Wph = std * jax.random.normal(k_wph, (num_classes, num_hidden), jnp.float32)
    bh = std * jax.random.normal(k_bh, (num_hidden,), jnp.float32)
    bp = std * jax.random.normal(k_bp, (num_classes,), jnp.float32)

    # Palindrome-style integer-ish sequence input, shape (B, seq_length).
    x = jax.random.randint(k_x, (batch_size, seq_length), 0, 10).astype(jnp.float32)

    out = vanilla_rnn_forward(x, Whx, Whh, Wph, bh, bp)
    out = jax.block_until_ready(out)

    ref = vanilla_rnn_reference(x, Whx, Whh, Wph, bh, bp)
    assert out.shape == (batch_size, num_classes)
    assert jnp.allclose(out, ref, atol=1e-6, rtol=1e-5), "mismatch vs reference"

    print("KERNEL_OK")
</pallas_src>

<mosaic_0001>
module attributes {stable_mosaic.version = 11 : i64} {
  func.func @vanilla_rnn_kernel(%arg0: memref<72x1xf32, #tpu.memory_space<vmem>>, %arg1: memref<1x32xf32, #tpu.memory_space<vmem>>, %arg2: memref<32x32xf32, #tpu.memory_space<vmem>>, %arg3: memref<32x128xf32, #tpu.memory_space<vmem>>, %arg4: memref<1x32xf32, #tpu.memory_space<vmem>>, %arg5: memref<1x128xf32, #tpu.memory_space<vmem>>, %arg6: memref<8x128xf32, #tpu.memory_space<vmem>>) attributes {dimension_semantics = [], scalar_prefetch = 0 : i64, scratch_operands = 0 : i64, tpu.core_type = #tpu.core_type<tc>} {
    %c0 = arith.constant 0 : index
    %c0_0 = arith.constant 0 : index
    %0 = vector.load %arg2[%c0, %c0_0] : memref<32x32xf32, #tpu.memory_space<vmem>>, vector<32x32xf32>
    %c0_1 = arith.constant 0 : index
    %c0_2 = arith.constant 0 : index
    %1 = vector.load %arg0[%c0_1, %c0_2] : memref<72x1xf32, #tpu.memory_space<vmem>>, vector<72x1xf32>
    %c0_3 = arith.constant 0 : index
    %c0_4 = arith.constant 0 : index
    %2 = vector.load %arg1[%c0_3, %c0_4] : memref<1x32xf32, #tpu.memory_space<vmem>>, vector<1x32xf32>
    %3 = vector.broadcast %1 : vector<72x1xf32> to vector<72x32xf32>
    %4 = vector.broadcast %2 : vector<1x32xf32> to vector<72x32xf32>
    %5 = arith.mulf %3, %4 : vector<72x32xf32>
    %c0_5 = arith.constant 0 : index
    %c0_6 = arith.constant 0 : index
    %6 = vector.load %arg4[%c0_5, %c0_6] : memref<1x32xf32, #tpu.memory_space<vmem>>, vector<1x32xf32>
    %7 = vector.broadcast %6 : vector<1x32xf32> to vector<72x32xf32>
    %8 = arith.addf %5, %7 : vector<72x32xf32>
    %9 = vector.shape_cast %8 : vector<72x32xf32> to vector<9x8x32xf32>
    %10 = vector.extract_strided_slice %9 {offsets = [0, 0, 0], sizes = [1, 8, 32], strides = [1, 1, 1]} : vector<9x8x32xf32> to vector<1x8x32xf32>
    %11 = vector.shape_cast %10 : vector<1x8x32xf32> to vector<8x32xf32>
    %12 = math.tanh %11 : vector<8x32xf32>
    %13 = vector.extract_strided_slice %9 {offsets = [1, 0, 0], sizes = [1, 8, 32], strides = [1, 1, 1]} : vector<9x8x32xf32> to vector<1x8x32xf32>
    %14 = vector.shape_cast %13 : vector<1x8x32xf32> to vector<8x32xf32>
    %cst = arith.constant dense<0.000000e+00> : vector<8x32xf32>
    %15 = tpu.matmul %12, %0, %cst {dimension_numbers = #tpu.dot_dimension_numbers<[1], [0], [0], [1], [0, 0, 1, 1], [], []>} : vector<8x32xf32>, vector<32x32xf32>, vector<8x32xf32> -> vector<8x32xf32>
    %16 = arith.addf %14, %15 : vector<8x32xf32>
    %17 = math.tanh %16 : vector<8x32xf32>
    %18 = vector.extract_strided_slice %9 {offsets = [2, 0, 0], sizes = [1, 8, 32], strides = [1, 1, 1]} : vector<9x8x32xf32> to vector<1x8x32xf32>
    %19 = vector.shape_cast %18 : vector<1x8x32xf32> to vector<8x32xf32>
    %cst_7 = arith.constant dense<0.000000e+00> : vector<8x32xf32>
    %20 = tpu.matmul %17, %0, %cst_7 {dimension_numbers = #tpu.dot_dimension_numbers<[1], [0], [0], [1], [0, 0, 1, 1], [], []>} : vector<8x32xf32>, vector<32x32xf32>, vector<8x32xf32> -> vector<8x32xf32>
    %21 = arith.addf %19, %20 : vector<8x32xf32>
    %22 = math.tanh %21 : vector<8x32xf32>
    %23 = vector.extract_strided_slice %9 {offsets = [3, 0, 0], sizes = [1, 8, 32], strides = [1, 1, 1]} : vector<9x8x32xf32> to vector<1x8x32xf32>
    %24 = vector.shape_cast %23 : vector<1x8x32xf32> to vector<8x32xf32>
    %cst_8 = arith.constant dense<0.000000e+00> : vector<8x32xf32>
    %25 = tpu.matmul %22, %0, %cst_8 {dimension_numbers = #tpu.dot_dimension_numbers<[1], [0], [0], [1], [0, 0, 1, 1], [], []>} : vector<8x32xf32>, vector<32x32xf32>, vector<8x32xf32> -> vector<8x32xf32>
    %26 = arith.addf %24, %25 : vector<8x32xf32>
    %27 = math.tanh %26 : vector<8x32xf32>
    %28 = vector.extract_strided_slice %9 {offsets = [4, 0, 0], sizes = [1, 8, 32], strides = [1, 1, 1]} : vector<9x8x32xf32> to vector<1x8x32xf32>
    %29 = vector.shape_cast %28 : vector<1x8x32xf32> to vector<8x32xf32>
    %cst_9 = arith.constant dense<0.000000e+00> : vector<8x32xf32>
    %30 = tpu.matmul %27, %0, %cst_9 {dimension_numbers = #tpu.dot_dimension_numbers<[1], [0], [0], [1], [0, 0, 1, 1], [], []>} : vector<8x32xf32>, vector<32x32xf32>, vector<8x32xf32> -> vector<8x32xf32>
    %31 = arith.addf %29, %30 : vector<8x32xf32>
    %32 = math.tanh %31 : vector<8x32xf32>
    %33 = vector.extract_strided_slice %9 {offsets = [5, 0, 0], sizes = [1, 8, 32], strides = [1, 1, 1]} : vector<9x8x32xf32> to vector<1x8x32xf32>
    %34 = vector.shape_cast %33 : vector<1x8x32xf32> to vector<8x32xf32>
    %cst_10 = arith.constant dense<0.000000e+00> : vector<8x32xf32>
    %35 = tpu.matmul %32, %0, %cst_10 {dimension_numbers = #tpu.dot_dimension_numbers<[1], [0], [0], [1], [0, 0, 1, 1], [], []>} : vector<8x32xf32>, vector<32x32xf32>, vector<8x32xf32> -> vector<8x32xf32>
    %36 = arith.addf %34, %35 : vector<8x32xf32>
    %37 = math.tanh %36 : vector<8x32xf32>
    %38 = vector.extract_strided_slice %9 {offsets = [6, 0, 0], sizes = [1, 8, 32], strides = [1, 1, 1]} : vector<9x8x32xf32> to vector<1x8x32xf32>
    %39 = vector.shape_cast %38 : vector<1x8x32xf32> to vector<8x32xf32>
    %cst_11 = arith.constant dense<0.000000e+00> : vector<8x32xf32>
    %40 = tpu.matmul %37, %0, %cst_11 {dimension_numbers = #tpu.dot_dimension_numbers<[1], [0], [0], [1], [0, 0, 1, 1], [], []>} : vector<8x32xf32>, vector<32x32xf32>, vector<8x32xf32> -> vector<8x32xf32>
    %41 = arith.addf %39, %40 : vector<8x32xf32>
    %42 = math.tanh %41 : vector<8x32xf32>
    %43 = vector.extract_strided_slice %9 {offsets = [7, 0, 0], sizes = [1, 8, 32], strides = [1, 1, 1]} : vector<9x8x32xf32> to vector<1x8x32xf32>
    %44 = vector.shape_cast %43 : vector<1x8x32xf32> to vector<8x32xf32>
    %cst_12 = arith.constant dense<0.000000e+00> : vector<8x32xf32>
    %45 = tpu.matmul %42, %0, %cst_12 {dimension_numbers = #tpu.dot_dimension_numbers<[1], [0], [0], [1], [0, 0, 1, 1], [], []>} : vector<8x32xf32>, vector<32x32xf32>, vector<8x32xf32> -> vector<8x32xf32>
    %46 = arith.addf %44, %45 : vector<8x32xf32>
    %47 = math.tanh %46 : vector<8x32xf32>
    %48 = vector.extract_strided_slice %9 {offsets = [8, 0, 0], sizes = [1, 8, 32], strides = [1, 1, 1]} : vector<9x8x32xf32> to vector<1x8x32xf32>
    %49 = vector.shape_cast %48 : vector<1x8x32xf32> to vector<8x32xf32>
    %cst_13 = arith.constant dense<0.000000e+00> : vector<8x32xf32>
    %50 = tpu.matmul %47, %0, %cst_13 {dimension_numbers = #tpu.dot_dimension_numbers<[1], [0], [0], [1], [0, 0, 1, 1], [], []>} : vector<8x32xf32>, vector<32x32xf32>, vector<8x32xf32> -> vector<8x32xf32>
    %51 = arith.addf %49, %50 : vector<8x32xf32>
    %52 = math.tanh %51 : vector<8x32xf32>
    %c0_14 = arith.constant 0 : index
    %c0_15 = arith.constant 0 : index
    %53 = vector.load %arg3[%c0_14, %c0_15] : memref<32x128xf32, #tpu.memory_space<vmem>>, vector<32x128xf32>
    %cst_16 = arith.constant dense<0.000000e+00> : vector<8x128xf32>
    %54 = tpu.matmul %52, %53, %cst_16 {dimension_numbers = #tpu.dot_dimension_numbers<[1], [0], [0], [1], [0, 0, 1, 1], [], []>} : vector<8x32xf32>, vector<32x128xf32>, vector<8x128xf32> -> vector<8x128xf32>
    %c0_17 = arith.constant 0 : index
    %c0_18 = arith.constant 0 : index
    %55 = vector.load %arg5[%c0_17, %c0_18] : memref<1x128xf32, #tpu.memory_space<vmem>>, vector<1x128xf32>
    %56 = vector.broadcast %55 : vector<1x128xf32> to vector<8x128xf32>
    %57 = arith.addf %54, %56 : vector<8x128xf32>
    %c0_19 = arith.constant 0 : index
    %c0_20 = arith.constant 0 : index
    %58 = vector.load %arg6[%c0_19, %c0_20] : memref<8x128xf32, #tpu.memory_space<vmem>>, vector<8x128xf32>
    tpu.vector_store %arg6[%c0_19, %c0_20], %57 {strides = array<i32>} : memref<8x128xf32, #tpu.memory_space<vmem>>, vector<8x128xf32>,
    return
  }
}

</mosaic_0001>

<bundles_post_ra>
// kernel: tpu_custom_call.1
= control target key start
LH: loop header
LB: loop body
LE: loop exit
PB: predicated region body
PF: predicated region fallthrough
CT: control target
= control target key end

     0   :  { %v1074_v1 = vmov 0   ;;  %s1273_s0 = inlined_call_operand.vmem [shape: f32[72,1], index: 0, kind: input, shape index: {}]   ;;  %s1274_s1 = inlined_call_operand.vmem [shape: f32[1,32], index: 1, kind: input, shape index: {}]   ;;  %s1275_s2 = inlined_call_operand.vmem [shape: f32[32,32], index: 2, kind: input, shape index: {}]   ;;  %s1276_s3 = inlined_call_operand.vmem [shape: f32[32,128], index: 3, kind: input, shape index: {}]   ;;  %s1277_s4 = inlined_call_operand.vmem [shape: f32[1,32], index: 4, kind: input, shape index: {}]   ;;  %s1278_s5 = inlined_call_operand.vmem [shape: f32[1,128], index: 5, kind: input, shape index: {}]   ;;  %s1279_s6 = inlined_call_operand.hbm [shape: f32[8,128], index: 6, kind: output, shape index: {}]  }
   0x1   :  { %v28_v0 = vld [vmem:[%s1273_s0] sm:$0xff]  ;;  %1030 = vset.pattern.permute.xlu0 %v1074_v1  ;;  %1031 = vset.pattern.permute.xlu1 %v1074_v1 }
   0x2   :  { %40 = vperm.xlu0 %1030, %v28_v0  }
   0x3   :  { %11 = vsyncpa [#allocation3], 0  ;;  %v29_v2 = vld [vmem:[%s1273_s0 + $0x8] sm:$0xff]  ;;  %v32_v3 = vld [vmem:[%s1273_s0 + $0x20] sm:$0xff]  ;;  %v1075_v4 = vmov 0.0|0.0   ;;  %vm1076_vm0 = vmmov 0  }
   0x4   :  { %971 = vmatprep.subr.bf16.mxu0 %v1075_v4  ;;  %v24_v5 = vld [vmem:[%s1275_s2] sm:$0xff]  ;;  %v25_v6 = vld [vmem:[%s1275_s2 + $0x8] sm:$0xff]  ;;  %977 = vmatprep.subr.bf16.mxu1 %v1075_v4  ;;  %v34_v8 = vld [vmem:[%s1273_s0 + $0x30] sm:$0xff]  ;;  %v1077_v13 = vmov 0.0   ;;  %vm115_vm1 = vcmask 261120  }
   0x5   :  { %v1131_v7 = vpack.c.bf16 %v25_v6, %v24_v5  ;;  %v26_v9 = vld [vmem:[%s1275_s2 + $0x10] sm:$0xff]  ;;  %v27_v10 = vld [vmem:[%s1275_s2 + $0x18] sm:$0xff]  ;;  %v36_v12 = vld [vmem:[%s1273_s0 + $0x40] sm:$0xff]  ;;  %880 = vmatprep.mubr.msk.f32.mxu0 %vm1076_vm0, %v1077_v13  ;;  %891 = vmatprep.mubr.msk.f32.mxu1 %vm1076_vm0, %v1077_v13 }
   0x6   :  { %45 = vperm.xlu0 %1030, %v29_v2   ;;  %v1145_v11 = vpack.c.bf16 %v27_v10, %v26_v9  ;;  %v1162_v14 = vld [vmem:[%s1274_s1] ss:$0 sm:$0xff]  ;;  %v30_v20 = vld [vmem:[%s1273_s0 + $0x10] sm:$0xff]  ;;  %v31_v21 = vld [vmem:[%s1273_s0 + $0x18] sm:$0xff] }
   0x7   :  { %973 = vmatpush3.bf16.msra.mxu0 %v1131_v7  ;;  %979 = vmatpush3.bf16.msra.mxu1 %v1131_v7  ;;  %v1167_v15 = vld [vmem:[%s1277_s4] ss:$0 sm:$0xff]  ;;  %v33_v22 = vld [vmem:[%s1273_s0 + $0x28] sm:$0xff]  ;;  %v35_v23 = vld [vmem:[%s1273_s0 + $0x38] sm:$0xff] }
   0x8   :  { %974 = vmatprep.subr.bf16.mxu0 %v1075_v4  ;;  %980 = vmatprep.subr.bf16.mxu1 %v1075_v4  ;;  %v716_v10 = vld [vmem:[%s1276_s3] sm:$0xff] }
   0x9   :  { %50 = vperm.xlu1 %1031, %v30_v20  }
   0xa   :  { %60 = vperm.xlu0 %1030, %v32_v3  }
   0xb   :  { %976 = vmatpush3.bf16.msra.mxu0 %v1145_v11  ;;  %982 = vmatpush3.bf16.msra.mxu1 %v1145_v11 }
   0xc   :  { %983 = vmatprep.subr.bf16.mxu0 %v1075_v4  ;;  %989 = vmatprep.subr.bf16.mxu1 %v1075_v4 }
   0xd   :  { %55 = vperm.xlu1 %1031, %v31_v21  }
   0xe   :  { %70 = vperm.xlu0 %1030, %v34_v8  }
  0x11   :  { %65 = vperm.xlu1 %1031, %v33_v22  }
  0x12   :  { %80 = vperm.xlu0 %1030, %v36_v12   ;;  %v718_v12 = vld [vmem:[%s1276_s3 + $0x10] sm:$0xff] }
  0x15   :  { %75 = vperm.xlu1 %1031, %v35_v23  }
  0x81   :  { %v41_v16 = vpop.permute.xlu0 %40 }
  0x82   :  { %v89_v17 = vmul.f32 %v1162_v14, %v41_v16  ;;  %v719_v16 = vld [vmem:[%s1276_s3 + $0x18] sm:$0xff] }
  0x84   :  { %v105_v18 = vadd.f32 %v1167_v15, %v89_v17  ;;  %v1023_v17 = vpack.c.bf16 %v719_v16, %v718_v12 }
  0x85   :  { %v46_v24 = vpop.permute.xlu0 %45 }
  0x86   :  { %1032 = vtanh.f32 %v105_v18  ;;  %v90_v25 = vmul.f32 %v1162_v14, %v46_v24 }
  0x88   :  { %v106_v26 = vadd.f32 %v1167_v15, %v90_v25  ;;  %v51_v31 = vpop.permute.xlu1 %50  ;;  %v825_v25 = vld [vmem:[%s1278_s5] ss:$0 sm:$0xff] }
  0x89   :  { %v91_v32 = vmul.f32 %v1162_v14, %v51_v31  ;;  %v61_v45 = vpop.permute.xlu0 %60 }
  0x8a   :  { %v93_v46 = vmul.f32 %v1162_v14, %v61_v45 }
  0x8b   :  { %v107_v33 = vadd.f32 %v1167_v15, %v91_v32 }
  0x8c   :  { %v56_v38 = vpop.permute.xlu1 %55  ;;  %v109_v47 = vadd.f32 %v1167_v15, %v93_v46 }
  0x8d   :  { %v92_v39 = vmul.f32 %v1162_v14, %v56_v38  ;;  %v71_v59 = vpop.permute.xlu0 %70 }
  0x8e   :  { %v95_v60 = vmul.f32 %v1162_v14, %v71_v59 }
  0x8f   :  { %v108_v40 = vadd.f32 %v1167_v15, %v92_v39 }
  0x90   :  { %v1033_v19 = vpop.eup %1032  ;;  %v66_v52 = vpop.permute.xlu1 %65  ;;  %v111_v61 = vadd.f32 %v1167_v15, %v95_v60 }
  0x91   :  { %881 = vmatmul.mubr.msk.f32.vlgmr.msra.gmra.mrb[0].mxu0 %vm115_vm1, %v1033_v19  ;;  %v94_v53 = vmul.f32 %v1162_v14, %v66_v52  ;;  %v81_v18 = vpop.permute.xlu0 %80 }
  0x92   :  { %985 = vmatpush3.bf16.msra.mxu0 %v1131_v7  ;;  %902 = vmatprep.mubr.msk.f32.mxu0 %vm1076_vm0, %v1077_v13  ;;  %v97_v19 = vmul.f32 %v1162_v14, %v81_v18 }
  0x93   :  { %986 = vmatprep.subr.bf16.mxu0 %v1075_v4  ;;  %v110_v54 = vadd.f32 %v1167_v15, %v94_v53 }
  0x94   :  { %v76_v2 = vpop.permute.xlu1 %75  ;;  %v113_v20 = vadd.f32 %v1167_v15, %v97_v19 }
  0x95   :  { %v96_v3 = vmul.f32 %v1162_v14, %v76_v2 }
  0x96   :  { %988 = vmatpush3.bf16.msra.mxu0 %v1145_v11 }
  0x97   :  { %995 = vmatprep.subr.bf16.mxu0 %v1075_v4  ;;  %v112_v5 = vadd.f32 %v1167_v15, %v96_v3 }
 0x164   :  { %v185_v27 = vpop.f32.mrb[0].mxu0 }
 0x165   :  { %v189_v28 = vadd.f32 %v185_v27, %v106_v26  ;;  %v882_v29 = vpop.f32.mrb[1].mxu0 }
 0x167   :  { %1034 = vtanh.f32 %v189_v28 }
 0x171   :  { %v1035_v30 = vpop.eup %1034 }
 0x172   :  { %892 = vmatmul.mubr.msk.f32.vlgmr.msra.gmra.mrb[0].mxu1 %vm115_vm1, %v1035_v30 }
 0x173   :  { %991 = vmatpush3.bf16.msra.mxu1 %v1131_v7  ;;  %913 = vmatprep.mubr.msk.f32.mxu1 %vm1076_vm0, %v1077_v13 }
 0x174   :  { %992 = vmatprep.subr.bf16.mxu1 %v1075_v4 }
 0x177   :  { %994 = vmatpush3.bf16.msra.mxu1 %v1145_v11 }
 0x178   :  { %1001 = vmatprep.subr.bf16.mxu1 %v1075_v4 }
 0x245   :  { %v260_v34 = vpop.f32.mrb[0].mxu1 }
 0x246   :  { %v264_v35 = vadd.f32 %v260_v34, %v107_v33  ;;  %v893_v36 = vpop.f32.mrb[1].mxu1 }
 0x248   :  { %1036 = vtanh.f32 %v264_v35 }
 0x252   :  { %v1037_v37 = vpop.eup %1036 }
 0x253   :  { %903 = vmatmul.mubr.msk.f32.vlgmr.msra.gmra.mrb[2].mxu0 %vm115_vm1, %v1037_v37 }
 0x254   :  { %997 = vmatpush3.bf16.msra.mxu0 %v1131_v7  ;;  %924 = vmatprep.mubr.msk.f32.mxu0 %vm1076_vm0, %v1077_v13 }
 0x255   :  { %998 = vmatprep.subr.bf16.mxu0 %v1075_v4 }
 0x258   :  { %1000 = vmatpush3.bf16.msra.mxu0 %v1145_v11 }
 0x259   :  { %1007 = vmatprep.subr.bf16.mxu0 %v1075_v4 }
 0x326   :  { %v335_v41 = vpop.f32.mrb[2].mxu0 }
 0x327   :  { %v339_v42 = vadd.f32 %v335_v41, %v108_v40  ;;  %v904_v43 = vpop.f32.mrb[3].mxu0 }
 0x329   :  { %1038 = vtanh.f32 %v339_v42 }
 0x333   :  { %v1039_v44 = vpop.eup %1038 }
 0x334   :  { %914 = vmatmul.mubr.msk.f32.vlgmr.msra.gmra.mrb[2].mxu1 %vm115_vm1, %v1039_v44 }
 0x335   :  { %1003 = vmatpush3.bf16.msra.mxu1 %v1131_v7  ;;  %935 = vmatprep.mubr.msk.f32.mxu1 %vm1076_vm0, %v1077_v13 }
 0x336   :  { %1004 = vmatprep.subr.bf16.mxu1 %v1075_v4 }
 0x339   :  { %1006 = vmatpush3.bf16.msra.mxu1 %v1145_v11 }
 0x33a   :  { %1013 = vmatprep.subr.bf16.mxu1 %v1075_v4 }
 0x407   :  { %v410_v48 = vpop.f32.mrb[2].mxu1 }
 0x408   :  { %v414_v49 = vadd.f32 %v410_v48, %v109_v47  ;;  %v915_v50 = vpop.f32.mrb[3].mxu1 }
 0x40a   :  { %1040 = vtanh.f32 %v414_v49 }
 0x414   :  { %v1041_v51 = vpop.eup %1040 }
 0x415   :  { %925 = vmatmul.mubr.msk.f32.vlgmr.msra.gmra.mrb[4].mxu0 %vm115_vm1, %v1041_v51 }
 0x416   :  { %1009 = vmatpush3.bf16.msra.mxu0 %v1131_v7  ;;  %946 = vmatprep.mubr.msk.f32.mxu0 %vm1076_vm0, %v1077_v13 }
 0x417   :  { %1010 = vmatprep.subr.bf16.mxu0 %v1075_v4 }
 0x41a   :  { %1012 = vmatpush3.bf16.msra.mxu0 %v1145_v11 }
 0x41b   :  { %1019 = vmatprep.subr.bf16.mxu0 %v1075_v4 }
 0x4e8   :  { %v485_v55 = vpop.f32.mrb[4].mxu0 }
 0x4e9   :  { %v489_v56 = vadd.f32 %v485_v55, %v110_v54  ;;  %v926_v57 = vpop.f32.mrb[5].mxu0 }
 0x4eb   :  { %1042 = vtanh.f32 %v489_v56 }
 0x4f5   :  { %v1043_v58 = vpop.eup %1042 }
 0x4f6   :  { %936 = vmatmul.mubr.msk.f32.vlgmr.msra.gmra.mrb[4].mxu1 %vm115_vm1, %v1043_v58 }
 0x4f7   :  { %1015 = vmatpush3.bf16.msra.mxu1 %v1131_v7  ;;  %957 = vmatprep.mubr.msk.f32.mxu1 %vm1076_vm0, %v1077_v13 }
 0x4f8   :  { %1016 = vmatprep.subr.bf16.mxu1 %v1075_v4 }
 0x4fb   :  { %1018 = vmatpush3.bf16.msra.mxu1 %v1145_v11  ;;  %v717_v11 = vld [vmem:[%s1276_s3 + $0x8] sm:$0xff]  ;;  %s1078_s3 = smov [#allocation2]  }
 0x4fc   :  { %s807_s9 = sshll.u32 %s1078_s3, 4  ;;  %s808_s9 = int_to_ptr.vmem [resolvable:$true] %s807_s9 }
 0x4fd   :  { %s1050_s10 = scalar_lea.vmem %s808_s9, 128  ;;  %p1055_p1 = scmp.lt.s32.totalorder %s808_s9, %s808_s9 }
 0x4fe   :  { %p1051_p0 = scmp.ne.s32.totalorder %s808_s9, %s1050_s10  ;;  %p1056_p2 = scmp.lt.s32.totalorder %s1050_s10, %s1050_s10 }
 0x500   :  { %p1057_p3 = por %p1056_p2, %p1055_p1 }
 0x502   :  { %p1058_p4 = pnand %p1057_p3, %p1051_p0 }
 0x5c9   :  { %v560_v62 = vpop.f32.mrb[4].mxu1 }
 0x5ca   :  { %v564_v63 = vadd.f32 %v560_v62, %v111_v61  ;;  %v937_v0 = vpop.f32.mrb[5].mxu1 }
 0x5cc   :  { %1044 = vtanh.f32 %v564_v63 }
 0x5d6   :  { %v1045_v1 = vpop.eup %1044 }
 0x5d7   :  { %947 = vmatmul.mubr.msk.f32.vlgmr.msra.gmra.mrb[6].mxu0 %vm115_vm1, %v1045_v1 }
 0x5d8   :  { %968 = vmatprep.mubr.msk.f32.mxu0 %vm1076_vm0, %v1077_v13  ;;  %v1020_v13 = vpack.c.bf16 %v717_v11, %v716_v10 }
 0x5da   :  { %1021 = vmatpush3.bf16.msra.mxu0 %v1020_v13 }
 0x5db   :  { %1022 = vmatprep.subr.bf16.mxu0 %v1075_v4 }
 0x5de   :  { %1024 = vmatpush3.bf16.msra.mxu0 %v1023_v17 }
 0x6aa   :  { %v635_v6 = vpop.f32.mrb[6].mxu0 }
 0x6ab   :  { %v639_v7 = vadd.f32 %v635_v6, %v112_v5  ;;  %v948_v8 = vpop.f32.mrb[7].mxu0 }
 0x6ad   :  { %1046 = vtanh.f32 %v639_v7 }
 0x6b7   :  { %v1047_v9 = vpop.eup %1046 }
 0x6b8   :  { %958 = vmatmul.mubr.msk.f32.vlgmr.msra.gmra.mrb[6].mxu1 %vm115_vm1, %v1047_v9 }
 0x78b   :  { %v710_v21 = vpop.f32.mrb[6].mxu1 }
 0x78c   :  { %v714_v22 = vadd.f32 %v710_v21, %v113_v20  ;;  %v959_v23 = vpop.f32.mrb[7].mxu1 }
 0x78e   :  { %1048 = vtanh.f32 %v714_v22 }
 0x798   :  { %v1049_v24 = vpop.eup %1048 }
 0x799   :  { %969 = vmatmul.mubr.msk.f32.vlgmr.msra.gmra.mrb[8].mxu0 %vm115_vm1, %v1049_v24 }
 0x86c   :  { %v796_v4 = vpop.f32.mrb[8].mxu0 }
 0x86d   :  { %v797_v26 = vadd.f32 %v825_v25, %v796_v4  ;;  %v970_v27 = vpop.f32.mrb[9].mxu0 }
 0x86f   :  { %800 = vst [vmem:[#allocation2] sm:$0xff] %v797_v26 }
 0x870   :  { %1061 = shalt.err (!%p1058_p4)
}
 0x871   :  { %s1062_s13 = scalar_lea.hbm %s1279_s6, 128 }
 0x872   :  { %p1063_p5 = scmp.ne.s32.totalorder %s1279_s6, %s1062_s13  ;;  %p1066_p6 = scmp.lt.u32.totalorder %s1062_s13, %s1279_s6 }
 0x874   :  { %p1068_p7 = pnand %p1066_p6, %p1063_p5 }
 0x876   :  { %1071 = shalt.err (!%p1068_p7)
}
 0x877   :  { %810 = dma.vmem_to_hbm [thread:$0]  %s808_s9, 128, %s1279_s6, [#allocation3]  }
 0x878   :  { %1072 = dma.done.wait [#allocation3], 128  }
 0x879   :  { %1073 = vsyncadd [#allocation3], 4294967168 }
 0x87a   :  { %814 = vsyncpa [#allocation3], 1 }

</bundles_post_ra>
